<compile_context>
chip_gen: v7x
topology: tpu7x:2x2x1
jax: 0.10.0
libtpu: 0.0.40
codegen_flags: <defaults>
</compile_context>

<pallas_src>
import functools
import math

import jax
import jax.numpy as jnp
from jax.experimental import pallas as pl
from jax.experimental.pallas import tpu as pltpu


def _rmsnorm_kernel(x_ref, w_ref, o_ref, *, eps):
    # x_ref: (tm, dim) token tile; w_ref: (1, dim); o_ref: (tm, dim)
    x = x_ref[...].astype(jnp.float32)                    # x.float()
    ms = jnp.mean(x * x, axis=-1, keepdims=True)          # mean(x^2, -1)
    inv = jax.lax.rsqrt(ms + eps)                         # rsqrt -> EUP slot
    normed = (x * inv).astype(x_ref.dtype)                # .type_as(x)
    # weight * normed in the promoted dtype (matches torch's final multiply).
    o_ref[...] = (w_ref[...] * normed).astype(o_ref.dtype)


def _pick_tm(M, dim, in_itemsize, out_itemsize):
    """Token-tile rows: byte-sized, sublane-aligned, VMEM-budgeted, >=2 steps."""
    sub = {1: 32, 2: 16, 4: 8}.get(in_itemsize, 8)        # sublane multiple
    # Target ~2 MiB per input block to amortize per-step overhead.
    target_block_bytes = 2 << 20
    tm = max(sub, (target_block_bytes // (dim * in_itemsize)) // sub * sub)
    # VMEM budget: 2x in + 2x out (double-buffered) + ~8 B/elem f32 temps.
    vmem_budget = 24 << 20
    bytes_per_row = dim * (2 * in_itemsize + 2 * out_itemsize + 8)
    tm = min(tm, max(sub, (vmem_budget // bytes_per_row) // sub * sub))
    # Never bigger than the sublane-rounded token count.
    tm = min(tm, pl.cdiv(M, sub) * sub)
    # Keep >=2 grid steps when possible so "parallel" shards across v7x's 2 TCs.
    if M > 2 * sub:
        tm = min(tm, pl.cdiv(pl.cdiv(M, 2), sub) * sub)
    return tm


def rms_norm_pallas(x, weight, *, eps=1e-6):
    """x: (..., dim); weight: (dim,). Returns weight * rmsnorm(x), matching
    the PyTorch RMSNorm.forward."""
    orig_shape = x.shape
    dim = orig_shape[-1]
    assert weight.shape == (dim,)

    M = math.prod(orig_shape[:-1]) if len(orig_shape) > 1 else 1
    x2d = x.reshape(M, dim)
    w2d = weight.reshape(1, dim)
    out_dtype = jnp.result_type(x.dtype, weight.dtype)

    in_item = x2d.dtype.itemsize
    out_item = jnp.dtype(out_dtype).itemsize
    tm = _pick_tm(M, dim, in_item, out_item)
    grid = pl.cdiv(M, tm)                                 # partial last block OK

    cost = pl.CostEstimate(
        flops=4 * M * dim,                                # square, sum, scale, w-mul
        transcendentals=M,                                # one rsqrt per row
        bytes_accessed=M * dim * (in_item + out_item) + dim * weight.dtype.itemsize,
    )

    out2d = pl.pallas_call(
        functools.partial(_rmsnorm_kernel, eps=eps),
        out_shape=jax.ShapeDtypeStruct((M, dim), out_dtype),
        grid_spec=pltpu.PrefetchScalarGridSpec(
            num_scalar_prefetch=0,
            grid=(grid,),
            in_specs=[
                pl.BlockSpec((tm, dim), lambda i: (i, 0)),
                pl.BlockSpec((1, dim), lambda i: (0, 0)),
            ],
            out_specs=pl.BlockSpec((tm, dim), lambda i: (i, 0)),
        ),
        compiler_params=pltpu.CompilerParams(
            dimension_semantics=("parallel",),
            vmem_limit_bytes=32 << 20,
        ),
        cost_estimate=cost,
    )(x2d, w2d)

    return out2d.reshape(orig_shape)


def rms_norm_ref(x, weight, eps=1e-6):
    xf = x.astype(jnp.float32)
    normed = xf * jax.lax.rsqrt(jnp.mean(xf * xf, axis=-1, keepdims=True) + eps)
    return weight * normed.astype(x.dtype)


if __name__ == "__main__":
    # Small shapes consistent with the module: (batch, seq, dim) with a
    # lane-dense feature dim (multiple of 128).
    batch, seq, dim = 2, 8, 128
    eps = 1e-6

    key = jax.random.PRNGKey(0)
    kx, kw = jax.random.split(key)

    x = jax.random.normal(kx, (batch, seq, dim), dtype=jnp.float32)
    # Module initializes weight to ones; perturb slightly so the scale is exercised.
    weight = jnp.ones((dim,), jnp.float32) + 0.01 * jax.random.normal(
        kw, (dim,), jnp.float32)

    out = rms_norm_pallas(x, weight, eps=eps)
    out = jax.block_until_ready(out)

    ref = rms_norm_ref(x, weight, eps=eps)
    assert out.shape == (batch, seq, dim)
    assert jnp.allclose(out, ref, atol=1e-5, rtol=1e-5)

    # Non-divisible token count exercises the partial-last-block path
    # (21 rows, 2 grid steps of 16 rows, tail rows masked on store).
    x_odd = jax.random.normal(kx, (3, 7, dim), dtype=jnp.float32)
    out_odd = jax.block_until_ready(rms_norm_pallas(x_odd, weight, eps=eps))
    assert jnp.allclose(out_odd, rms_norm_ref(x_odd, weight, eps=eps),
                        atol=1e-5, rtol=1e-5)

    print("KERNEL_OK")
</pallas_src>

<mosaic_0001>
module attributes {stable_mosaic.version = 11 : i64} {
  func.func @_rmsnorm_kernel(%arg0: i32, %arg1: memref<16x128xf32, #tpu.memory_space<vmem>>, %arg2: memref<1x128xf32, #tpu.memory_space<vmem>>, %arg3: memref<16x128xf32, #tpu.memory_space<vmem>>) attributes {dimension_semantics = [#tpu.dimension_semantics<parallel>], iteration_bounds = array<i64: 1>, scalar_prefetch = 0 : i64, scratch_operands = 0 : i64, tpu.core_type = #tpu.core_type<tc>, window_params = [{transform_indices = @transform_0, window_bounds = array<i64: 16, 128>}, {pipeline_mode = #tpu.pipeline_mode<synchronous>, transform_indices = @transform_1, window_bounds = array<i64: 1, 128>}, {transform_indices = @transform_2, window_bounds = array<i64: 16, 128>}]} {
    %c0 = arith.constant 0 : index
    %c0_0 = arith.constant 0 : index
    %0 = vector.load %arg1[%c0, %c0_0] : memref<16x128xf32, #tpu.memory_space<vmem>>, vector<16x128xf32>
    %1 = arith.mulf %0, %0 : vector<16x128xf32>
    %cst = arith.constant dense<0.000000e+00> : vector<16xf32>
    %2 = vector.multi_reduction <add>, %1, %cst [1] : vector<16x128xf32> to vector<16xf32>
    %3 = vector.shape_cast %2 : vector<16xf32> to vector<16x1xf32>
    %cst_1 = arith.constant 1.280000e+02 : f32
    %4 = vector.broadcast %cst_1 : f32 to vector<16x1xf32>
    %5 = arith.divf %3, %4 : vector<16x1xf32>
    %cst_2 = arith.constant 9.99999997E-7 : f32
    %6 = vector.broadcast %cst_2 : f32 to vector<16x1xf32>
    %7 = arith.addf %5, %6 : vector<16x1xf32>
    %8 = math.rsqrt %7 : vector<16x1xf32>
    %9 = vector.broadcast %8 : vector<16x1xf32> to vector<16x128xf32>
    %10 = arith.mulf %0, %9 : vector<16x128xf32>
    %c0_3 = arith.constant 0 : index
    %c0_4 = arith.constant 0 : index
    %11 = vector.load %arg2[%c0_3, %c0_4] : memref<1x128xf32, #tpu.memory_space<vmem>>, vector<1x128xf32>
    %12 = vector.broadcast %11 : vector<1x128xf32> to vector<16x128xf32>
    %13 = arith.mulf %12, %10 : vector<16x128xf32>
    %c0_5 = arith.constant 0 : index
    %c0_6 = arith.constant 0 : index
    %14 = vector.load %arg3[%c0_5, %c0_6] : memref<16x128xf32, #tpu.memory_space<vmem>>, vector<16x128xf32>
    tpu.vector_store %arg3[%c0_5, %c0_6], %13 {strides = array<i32>} : memref<16x128xf32, #tpu.memory_space<vmem>>, vector<16x128xf32>,
    return
  }
  func.func @transform_0(%arg0: i32) -> (i32, i32) {
    %c0_i32 = arith.constant 0 : i32
    %c0_i32_0 = arith.constant 0 : i32
    return %arg0, %c0_i32 : i32, i32
  }
  func.func @transform_1(%arg0: i32) -> (i32, i32) {
    %c0_i32 = arith.constant 0 : i32
    %c0_i32_0 = arith.constant 0 : i32
    %c0_i32_1 = arith.constant 0 : i32
    return %c0_i32, %c0_i32_0 : i32, i32
  }
  func.func @transform_2(%arg0: i32) -> (i32, i32) {
    %c0_i32 = arith.constant 0 : i32
    %c0_i32_0 = arith.constant 0 : i32
    return %arg0, %c0_i32 : i32, i32
  }
}

</mosaic_0001>

<bundles_post_ra>
// kernel: tpu_custom_call.1
= control target key start
LH: loop header
LB: loop body
LE: loop exit
PB: predicated region body
PF: predicated region fallthrough
CT: control target
= control target key end

     0   :  { %7 = vsyncpa [#allocation3], 0  ;;  %s180_s0 = inlined_call_operand.hbm [shape: f32[16,128], index: 0, kind: input, shape index: {}]   ;;  %s181_s1 = inlined_call_operand.vmem [shape: f32[1,128], index: 1, kind: input, shape index: {}]   ;;  %s182_s2 = inlined_call_operand.hbm [shape: f32[16,128], index: 2, kind: output, shape index: {}]  }
   0x1   :  { %8 = vsyncpa [#allocation4], 0  ;;  %s128_s9 = smov [#allocation2]   ;;  %s80_s13 = scalar_lea.hbm %s180_s0, 256 }
   0x2   :  { %s14_s10 = sshll.u32 %s128_s9, 4  ;;  %p81_p0 = scmp.ne.s32.totalorder %s180_s0, %s80_s13  ;;  %s15_s10 = int_to_ptr.vmem [resolvable:$true] %s14_s10 }
   0x3   :  { %p84_p1 = scmp.lt.u32.totalorder %s80_s13, %s180_s0 }
   0x5   :  { %p86_p2 = pnand %p84_p1, %p81_p0 }
   0x7   :  { %89 = shalt.err (!%p86_p2)
}
   0x8   :  { %s90_s18 = scalar_lea.vmem %s15_s10, 256  ;;  %p95_p4 = scmp.lt.s32.totalorder %s15_s10, %s15_s10 }
   0x9   :  { %p91_p3 = scmp.ne.s32.totalorder %s15_s10, %s90_s18  ;;  %p96_p5 = scmp.lt.s32.totalorder %s90_s18, %s90_s18 }
   0xb   :  { %p97_p6 = por %p96_p5, %p95_p4 }
   0xd   :  { %p98_p7 = pnand %p97_p6, %p91_p3 }
   0xf   :  { %101 = shalt.err (!%p98_p7)
}
  0x10   :  { %s129_s19 = smov 128   ;;  %s130_s20 = smov 8  }
  0x11   :  { %20 = dma.hbm_to_vmem [thread:$0]  %s180_s0, 256, %s15_s10, [#allocation3], %s129_s19, %s129_s19, %s130_s20  }
  0x12   :  { %124 = dma.done.wait [#allocation3], 256  }
  0x13   :  { %125 = vsyncadd [#allocation3], 4294967040  ;;  %v26_v0 = vld [vmem:[#allocation2] sm:$0xff]  ;;  %v27_v1 = vld [vmem:[#allocation2 + $0x8] sm:$0xff]  ;;  %s131_s0 = smov [#allocation5]  }
  0x14   :  { %v28_v2 = vmul.f32 %v26_v0, %v26_v0  ;;  %v29_v3 = vmul.f32 %v27_v1, %v27_v1  ;;  %v71_v11 = vld [vmem:[%s181_s1] ss:$0 sm:$0xff]  ;;  %s59_s25 = sshll.u32 %s131_s0, 4  ;;  %s60_s25 = int_to_ptr.vmem [resolvable:$true] %s59_s25 }
  0x15   :  { %s102_s26 = scalar_lea.vmem %s60_s25, 256  ;;  %p107_p9 = scmp.lt.s32.totalorder %s60_s25, %s60_s25 }
  0x16   :  { %30 = vadd.xlane.f32.xlu0 %v28_v2  ;;  %p103_p8 = scmp.ne.s32.totalorder %s60_s25, %s102_s26  ;;  %p108_p10 = scmp.lt.s32.totalorder %s102_s26, %s102_s26 }
  0x18   :  { %p109_p11 = por %p108_p10, %p107_p9 }
  0x1a   :  { %32 = vadd.xlane.f32.xlu0 %v29_v3  ;;  %p110_p12 = pnand %p109_p11, %p103_p8 }
  0xa3   :  { %v31_v4 = vpop.xlane.xlu0 %30 }
  0xa4   :  { %v35_v5 = vmul.f32 0.0078125, %v31_v4 }
  0xa6   :  { %v37_v6 = vadd.f32 1e-06, %v35_v5 }
  0xa7   :  { %v33_v7 = vpop.xlane.xlu0 %32 }
  0xa8   :  { %76 = vrsqrt.f32 %v37_v6  ;;  %v36_v8 = vmul.f32 0.0078125, %v33_v7 }
  0xaa   :  { %v38_v9 = vadd.f32 1e-06, %v36_v8 }
  0xac   :  { %78 = vrsqrt.f32 %v38_v9 }
  0xb2   :  { %v77_v10 = vpop.eup %76 }
  0xb3   :  { %v41_v12 = vmul.f32 %v77_v10, %v26_v0 }
  0xb5   :  { %v50_v13 = vmul.f32 %v71_v11, %v41_v12 }
  0xb6   :  { %v79_v14 = vpop.eup %78 }
  0xb7   :  { %v42_v15 = vmul.f32 %v79_v14, %v27_v1  ;;  %52 = vst [vmem:[#allocation5] sm:$0xff] %v50_v13 }
  0xb9   :  { %v51_v16 = vmul.f32 %v71_v11, %v42_v15 }
  0xbb   :  { %53 = vst [vmem:[#allocation5 + $0x8] sm:$0xff] %v51_v16 }
  0xbc   :  { %113 = shalt.err (!%p110_p12)
}
  0xbd   :  { %s114_s1 = scalar_lea.hbm %s182_s2, 256 }
  0xbe   :  { %p115_p13 = scmp.ne.s32.totalorder %s182_s2, %s114_s1  ;;  %p118_p0 = scmp.lt.u32.totalorder %s114_s1, %s182_s2 }
  0xc0   :  { %p120_p1 = pnand %p118_p0, %p115_p13 }
  0xc2   :  { %123 = shalt.err (!%p120_p1)
}
  0xc3   :  { %65 = dma.vmem_to_hbm [thread:$0]  %s60_s25, 256, %s182_s2, [#allocation4], %s129_s19, %s129_s19, %s130_s20  }
  0xc4   :  { %126 = dma.done.wait [#allocation4], 256  }
  0xc5   :  { %127 = vsyncadd [#allocation4], 4294967040 }
  0xc6   :  { %69 = vsyncpa [#allocation3], 1 }
  0xc7   :  { %70 = vsyncpa [#allocation4], 1 }

</bundles_post_ra>
